<compile_context>
chip_gen: v7x
topology: tpu7x:2x2x1
jax: 0.10.0
libtpu: 0.0.40
codegen_flags: <defaults>
</compile_context>

<pallas_src>
import jax
import jax.numpy as jnp
from jax.experimental import pallas as pl
from jax.experimental.pallas import tpu as pltpu

_DIMS = [4, 100, 25, 1]  # fc1: 4->100, fc2: 100->25, fc3: 25->1
_HP = jax.lax.Precision.HIGHEST


def _round_up(n, m):
    return ((n + m - 1) // m) * m


def _mlp_kernel(x_ref,
                w1_ref, b1_ref,
                w2_ref, b2_ref,
                w3_ref, b3_ref,
                o_ref):
    # Activations are [features, TB]: batch on lanes -> lane-dense everywhere.
    h = x_ref[...]                                                         # (4, TB)
    # fc1: Linear(4 -> 100) + ReLU
    h = jnp.dot(w1_ref[...], h, preferred_element_type=jnp.float32,
                precision=_HP) + b1_ref[...]
    h = jnp.maximum(h, 0.0)                                                # (100, TB)
    # fc2: Linear(100 -> 25) + ReLU
    h = jnp.dot(w2_ref[...], h, preferred_element_type=jnp.float32,
                precision=_HP) + b2_ref[...]
    h = jnp.maximum(h, 0.0)                                                # (25, TB)
    # fc3: Linear(25 -> 1), no activation
    o_ref[...] = (jnp.dot(w3_ref[...], h, preferred_element_type=jnp.float32,
                          precision=_HP) + b3_ref[...]).astype(o_ref.dtype)  # (1, TB)


def dqn_xy4_forward(x, params, *, block_b=2048):
    """Forward pass of DQN_xy4.

    x: [B, ...] with prod(...) == 4 (flattened like x.view(B, -1)), float32.
    params: list of (W [out, in], b [out]) exactly as PyTorch nn.Linear stores them.
    Returns [B, 1] float32.
    """
    (w1, b1), (w2, b2), (w3, b3) = params

    B = x.shape[0]
    x2 = x.reshape(B, -1).astype(jnp.float32)          # [B, 4]  (the .view flatten)
    F = x2.shape[1]

    # Batch on lanes: pad B up to a multiple of the batch tile (lane multiple of 128).
    TB = min(block_b, _round_up(B, 128))
    Bp = _round_up(B, TB)
    xT = jnp.zeros((F, Bp), jnp.float32).at[:, :B].set(x2.T)   # [4, Bp]

    # Biases as column vectors so they broadcast along the lane (batch) axis.
    b1c = b1.reshape(-1, 1)
    b2c = b2.reshape(-1, 1)
    b3c = b3.reshape(-1, 1)

    # Weights/biases: full-array blocks, index_map always (0, 0) -> VMEM-resident,
    # DMAed once for the whole grid.
    def resident(shape):
        return pl.BlockSpec(shape, lambda i: (0, 0))

    out = pl.pallas_call(
        _mlp_kernel,
        out_shape=jax.ShapeDtypeStruct((1, Bp), jnp.float32),
        grid=(Bp // TB,),
        in_specs=[
            pl.BlockSpec((F, TB), lambda i: (0, i)),   # x: streamed over batch tiles
            resident(w1.shape), resident(b1c.shape),
            resident(w2.shape), resident(b2c.shape),
            resident(w3.shape), resident(b3c.shape),
        ],
        out_specs=pl.BlockSpec((1, TB), lambda i: (0, i)),
        compiler_params=pltpu.CompilerParams(
            dimension_semantics=("parallel",),         # shard batch over v7x's 2 TCs
        ),
    )(xT, w1, b1c, w2, b2c, w3, b3c)

    # (1, Bp) -> (B, 1)
    return out[0, :B].reshape(B, 1)


def init_params(key):
    """Deterministic init mimicking PyTorch Linear default U[-1/sqrt(in), 1/sqrt(in)].

    Returns list of (W [out, in], b [out]) float32 — native PyTorch layout.
    """
    params = []
    for i in range(len(_DIMS) - 1):
        fan_in, fan_out = _DIMS[i], _DIMS[i + 1]
        key, kw, kb = jax.random.split(key, 3)
        bound = 1.0 / (fan_in ** 0.5)
        w = jax.random.uniform(kw, (fan_out, fan_in), jnp.float32,
                               minval=-bound, maxval=bound)
        b = jax.random.uniform(kb, (fan_out,), jnp.float32,
                               minval=-bound, maxval=bound)
        params.append((w, b))
    return params


def reference_forward(x, params):
    """Plain-JAX reference matching PyTorch semantics (y = x @ W.T + b)."""
    h = x.reshape(x.shape[0], -1)
    (w1, b1), (w2, b2), (w3, b3) = params
    h = jnp.maximum(jnp.dot(h, w1.T, precision=_HP) + b1, 0.0)
    h = jnp.maximum(jnp.dot(h, w2.T, precision=_HP) + b2, 0.0)
    return jnp.dot(h, w3.T, precision=_HP) + b3


if __name__ == "__main__":
    key = jax.random.PRNGKey(0)
    k_params, k_x1, k_x2 = jax.random.split(key, 3)
    params = init_params(k_params)

    # Small case (single grid step, batch padded 8 -> 128 lanes).
    x = jax.random.normal(k_x1, (8, 4), jnp.float32)
    out = jax.block_until_ready(dqn_xy4_forward(x, params))
    ref = reference_forward(x, params)
    assert out.shape == (8, 1), out.shape
    assert jnp.allclose(out, ref, atol=1e-4, rtol=1e-4), (out, ref)

    # Multi-step grid + non-multiple batch (exercises index_maps and padding).
    x2 = jax.random.normal(k_x2, (300, 4), jnp.float32)
    out2 = jax.block_until_ready(dqn_xy4_forward(x2, params, block_b=128))
    ref2 = reference_forward(x2, params)
    assert out2.shape == (300, 1), out2.shape
    assert jnp.allclose(out2, ref2, atol=1e-4, rtol=1e-4), (out2, ref2)

    print("KERNEL_OK")
</pallas_src>

<mosaic_0001>
module attributes {stable_mosaic.version = 11 : i64} {
  func.func @_mlp_kernel(%arg0: i32, %arg1: memref<4x128xf32, #tpu.memory_space<vmem>>, %arg2: memref<100x4xf32, #tpu.memory_space<vmem>>, %arg3: memref<100x1xf32, #tpu.memory_space<vmem>>, %arg4: memref<25x100xf32, #tpu.memory_space<vmem>>, %arg5: memref<25x1xf32, #tpu.memory_space<vmem>>, %arg6: memref<1x25xf32, #tpu.memory_space<vmem>>, %arg7: memref<1x1xf32, #tpu.memory_space<vmem>>, %arg8: memref<1x128xf32, #tpu.memory_space<vmem>>) attributes {dimension_semantics = [#tpu.dimension_semantics<parallel>], iteration_bounds = array<i64: 1>, scalar_prefetch = 0 : i64, scratch_operands = 0 : i64, tpu.core_type = #tpu.core_type<tc>, window_params = [{transform_indices = @transform_0, window_bounds = array<i64: 4, 128>}, {pipeline_mode = #tpu.pipeline_mode<synchronous>, transform_indices = @transform_1, window_bounds = array<i64: 100, 4>}, {pipeline_mode = #tpu.pipeline_mode<synchronous>, transform_indices = @transform_2, window_bounds = array<i64: 100, 1>}, {pipeline_mode = #tpu.pipeline_mode<synchronous>, transform_indices = @transform_3, window_bounds = array<i64: 25, 100>}, {pipeline_mode = #tpu.pipeline_mode<synchronous>, transform_indices = @transform_4, window_bounds = array<i64: 25, 1>}, {pipeline_mode = #tpu.pipeline_mode<synchronous>, transform_indices = @transform_5, window_bounds = array<i64: 1, 25>}, {pipeline_mode = #tpu.pipeline_mode<synchronous>, transform_indices = @transform_6, window_bounds = array<i64: 1, 1>}, {transform_indices = @transform_7, window_bounds = array<i64: 1, 128>}]} {
    %c0 = arith.constant 0 : index
    %c0_0 = arith.constant 0 : index
    %0 = vector.load %arg1[%c0, %c0_0] : memref<4x128xf32, #tpu.memory_space<vmem>>, vector<4x128xf32>
    %c0_1 = arith.constant 0 : index
    %c0_2 = arith.constant 0 : index
    %1 = vector.load %arg2[%c0_1, %c0_2] : memref<100x4xf32, #tpu.memory_space<vmem>>, vector<100x4xf32>
    %cst = arith.constant dense<0.000000e+00> : vector<100x128xf32>
    %2 = tpu.matmul %1, %0, %cst {dimension_numbers = #tpu.dot_dimension_numbers<[1], [0], [0], [1], [0, 0, 1, 1], [], []>, precision = #tpu.contract_precision<fp32>} : vector<100x4xf32>, vector<4x128xf32>, vector<100x128xf32> -> vector<100x128xf32>
    %c0_3 = arith.constant 0 : index
    %c0_4 = arith.constant 0 : index
    %3 = vector.load %arg3[%c0_3, %c0_4] : memref<100x1xf32, #tpu.memory_space<vmem>>, vector<100x1xf32>
    %4 = vector.broadcast %3 : vector<100x1xf32> to vector<100x128xf32>
    %5 = arith.addf %2, %4 : vector<100x128xf32>
    %cst_5 = arith.constant 0.000000e+00 : f32
    %6 = vector.broadcast %cst_5 : f32 to vector<100x128xf32>
    %7 = arith.maximumf %5, %6 : vector<100x128xf32>
    %c0_6 = arith.constant 0 : index
    %c0_7 = arith.constant 0 : index
    %8 = vector.load %arg4[%c0_6, %c0_7] : memref<25x100xf32, #tpu.memory_space<vmem>>, vector<25x100xf32>
    %cst_8 = arith.constant dense<0.000000e+00> : vector<25x128xf32>
    %9 = tpu.matmul %8, %7, %cst_8 {dimension_numbers = #tpu.dot_dimension_numbers<[1], [0], [0], [1], [0, 0, 1, 1], [], []>, precision = #tpu.contract_precision<fp32>} : vector<25x100xf32>, vector<100x128xf32>, vector<25x128xf32> -> vector<25x128xf32>
    %c0_9 = arith.constant 0 : index
    %c0_10 = arith.constant 0 : index
    %10 = vector.load %arg5[%c0_9, %c0_10] : memref<25x1xf32, #tpu.memory_space<vmem>>, vector<25x1xf32>
    %11 = vector.broadcast %10 : vector<25x1xf32> to vector<25x128xf32>
    %12 = arith.addf %9, %11 : vector<25x128xf32>
    %cst_11 = arith.constant 0.000000e+00 : f32
    %13 = vector.broadcast %cst_11 : f32 to vector<25x128xf32>
    %14 = arith.maximumf %12, %13 : vector<25x128xf32>
    %c0_12 = arith.constant 0 : index
    %c0_13 = arith.constant 0 : index
    %15 = vector.load %arg6[%c0_12, %c0_13] : memref<1x25xf32, #tpu.memory_space<vmem>>, vector<1x25xf32>
    %cst_14 = arith.constant dense<0.000000e+00> : vector<1x128xf32>
    %16 = tpu.matmul %15, %14, %cst_14 {dimension_numbers = #tpu.dot_dimension_numbers<[1], [0], [0], [1], [0, 0, 1, 1], [], []>, precision = #tpu.contract_precision<fp32>} : vector<1x25xf32>, vector<25x128xf32>, vector<1x128xf32> -> vector<1x128xf32>
    %c0_15 = arith.constant 0 : index
    %c0_16 = arith.constant 0 : index
    %17 = vector.load %arg7[%c0_15, %c0_16] : memref<1x1xf32, #tpu.memory_space<vmem>>, vector<1x1xf32>
    %18 = vector.broadcast %17 : vector<1x1xf32> to vector<1x128xf32>
    %19 = arith.addf %16, %18 : vector<1x128xf32>
    %c0_17 = arith.constant 0 : index
    %c0_18 = arith.constant 0 : index
    %20 = vector.load %arg8[%c0_17, %c0_18] : memref<1x128xf32, #tpu.memory_space<vmem>>, vector<1x128xf32>
    tpu.vector_store %arg8[%c0_17, %c0_18], %19 {strides = array<i32>} : memref<1x128xf32, #tpu.memory_space<vmem>>, vector<1x128xf32>,
    return
  }
  func.func @transform_0(%arg0: i32) -> (i32, i32) {
    %c0_i32 = arith.constant 0 : i32
    %c0_i32_0 = arith.constant 0 : i32
    return %c0_i32, %arg0 : i32, i32
  }
  func.func @transform_1(%arg0: i32) -> (i32, i32) {
    %c0_i32 = arith.constant 0 : i32
    %c0_i32_0 = arith.constant 0 : i32
    %c0_i32_1 = arith.constant 0 : i32
    return %c0_i32, %c0_i32_0 : i32, i32
  }
  func.func @transform_2(%arg0: i32) -> (i32, i32) {
    %c0_i32 = arith.constant 0 : i32
    %c0_i32_0 = arith.constant 0 : i32
    %c0_i32_1 = arith.constant 0 : i32
    return %c0_i32, %c0_i32_0 : i32, i32
  }
  func.func @transform_3(%arg0: i32) -> (i32, i32) {
    %c0_i32 = arith.constant 0 : i32
    %c0_i32_0 = arith.constant 0 : i32
    %c0_i32_1 = arith.constant 0 : i32
    return %c0_i32, %c0_i32_0 : i32, i32
  }
  func.func @transform_4(%arg0: i32) -> (i32, i32) {
    %c0_i32 = arith.constant 0 : i32
    %c0_i32_0 = arith.constant 0 : i32
    %c0_i32_1 = arith.constant 0 : i32
    return %c0_i32, %c0_i32_0 : i32, i32
  }
  func.func @transform_5(%arg0: i32) -> (i32, i32) {
    %c0_i32 = arith.constant 0 : i32
    %c0_i32_0 = arith.constant 0 : i32
    %c0_i32_1 = arith.constant 0 : i32
    return %c0_i32, %c0_i32_0 : i32, i32
  }
  func.func @transform_6(%arg0: i32) -> (i32, i32) {
    %c0_i32 = arith.constant 0 : i32
    %c0_i32_0 = arith.constant 0 : i32
    %c0_i32_1 = arith.constant 0 : i32
    return %c0_i32, %c0_i32_0 : i32, i32
  }
  func.func @transform_7(%arg0: i32) -> (i32, i32) {
    %c0_i32 = arith.constant 0 : i32
    %c0_i32_0 = arith.constant 0 : i32
    return %c0_i32, %arg0 : i32, i32
  }
}

</mosaic_0001>

<bundles_post_ra>
// kernel: tpu_custom_call.1
= control target key start
LH: loop header
LB: loop body
LE: loop exit
PB: predicated region body
PF: predicated region fallthrough
CT: control target
= control target key end

     0   :  { %s4361_s0 = inlined_call_operand.vmem [shape: f32[4,128], index: 0, kind: input, shape index: {}]   ;;  %s4362_s1 = inlined_call_operand.vmem [shape: f32[100,4], index: 1, kind: input, shape index: {}]   ;;  %s4363_s2 = inlined_call_operand.vmem [shape: f32[100,1], index: 2, kind: input, shape index: {}]   ;;  %s4364_s3 = inlined_call_operand.vmem [shape: f32[25,100], index: 3, kind: input, shape index: {}]   ;;  %s4365_s4 = inlined_call_operand.vmem [shape: f32[25,1], index: 4, kind: input, shape index: {}]   ;;  %s4366_s5 = inlined_call_operand.vmem [shape: f32[1,25], index: 5, kind: input, shape index: {}]   ;;  %s4367_s6 = inlined_call_operand.<no memory space> [shape: f32[1,1], index: 6, kind: input, shape index: {}]   ;;  %s4368_s7 = inlined_call_operand.hbm [shape: f32[1,128], index: 7, kind: output, shape index: {}]  }
   0x1   :  { %v12_v0 = vstv %s4367_s6 }
   0x2   :  { %13 = vst [vmem:[#allocation2] sm:$0x1] %v12_v0 }
   0x3   :  { %v29_v1 = vld [vmem:[%s4361_s0] sm:$0xf]  ;;  %vm161_vm0 = vcmask 1043456   ;;  %v3534_v2 = vmov 0.0   ;;  %vm3535_vm1 = vmmov 0   ;;  %vm121_vm2 = vcmask 31744  }
   0x4   :  { %2695 = vmatprep.subr.mxu0 %v3534_v2  ;;  %v163_v3 = vsel %vm161_vm0, %v29_v1, 0  ;;  %2697 = vmatprep.mubr.msk.f32.mxu0 %vm3535_vm1, %v3534_v2  ;;  %v30_v5 = vld [vmem:[%s4362_s1] sm:$0xff] }
   0x5   :  { %v3589_v4 = vand.u32 4294901760, %v163_v3  ;;  %2654 = vmatprep.subr.mxu1 %v3534_v2  ;;  %2656 = vmatprep.mubr.msk.f32.mxu1 %vm3535_vm1, %v3534_v2  ;;  %v123_v8 = vsel %vm121_vm2, %v30_v5, 0 }
   0x7   :  { %v3598_v6 = vsub.f32 %v163_v3, %v3589_v4  ;;  %2655 = vmatpush3.msra.mxu1 %v3589_v4 }
   0x9   :  { %v364_v7 = vand.u32 4294901760, %v3598_v6 }
   0xa   :  { %14 = vsyncpa [#allocation4], 0  ;;  %v31_v9 = vld [vmem:[%s4362_s1 + $0x8] sm:$0xff]  ;;  %v3609_v11 = vand.u32 4294901760, %v123_v8  ;;  %v32_v14 = vld [vmem:[%s4362_s1 + $0x10] sm:$0xff]  ;;  %vm1168_vm3 = vcmask 818176  }
   0xb   :  { %v365_v10 = vsub.f32 %v3598_v6, %v364_v7  ;;  %v126_v13 = vsel %vm121_vm2, %v31_v9, 0  ;;  %v129_v16 = vsel %vm121_vm2, %v32_v14, 0  ;;  %v33_v17 = vld [vmem:[%s4362_s1 + $0x18] sm:$0xff]  ;;  %v34_v20 = vld [vmem:[%s4362_s1 + $0x20] sm:$0xff]  ;;  %v35_v23 = vld [vmem:[%s4362_s1 + $0x28] sm:$0xff]  ;;  %vm1930_vm4 = vcmask 203776  }
   0xc   :  { %v3616_v15 = vand.u32 4294901760, %v126_v13  ;;  %v3628_v18 = vand.u32 4294901760, %v129_v16  ;;  %v132_v19 = vsel %vm121_vm2, %v33_v17, 0  ;;  %v135_v22 = vsel %vm121_vm2, %v34_v20, 0  ;;  %v36_v26 = vld [vmem:[%s4362_s1 + $0x30] sm:$0xff]  ;;  %v37_v29 = vld [vmem:[%s4362_s1 + $0x38] sm:$0xff] }
   0xd   :  { %v366_v12 = vand.u32 4294901760, %v365_v10  ;;  %v3637_v21 = vand.u32 4294901760, %v132_v19  ;;  %v3646_v24 = vand.u32 4294901760, %v135_v22  ;;  %v3651_v25 = vsel %vm121_vm2, %v35_v23, 0  ;;  %v38_v32 = vld [vmem:[%s4362_s1 + $0x40] sm:$0xff]  ;;  %v39_v36 = vld [vmem:[%s4362_s1 + $0x48] sm:$0xff] }
   0xe   :  { %v3658_v27 = vand.u32 4294901760, %v3651_v25  ;;  %v3663_v28 = vsel %vm121_vm2, %v36_v26, 0  ;;  %v3675_v31 = vsel %vm121_vm2, %v37_v29, 0  ;;  %v3685_v34 = vsub.f32 %v123_v8, %v3609_v11  ;;  %v40_v42 = vld [vmem:[%s4362_s1 + $0x50] sm:$0xff]  ;;  %v41_v49 = vld [vmem:[%s4362_s1 + $0x58] sm:$0xff] }
   0xf   :  { %2696 = vmatpush3.msra.mxu0 %v366_v12  ;;  %v3670_v30 = vand.u32 4294901760, %v3663_v28  ;;  %v3682_v33 = vand.u32 4294901760, %v3675_v31  ;;  %v3690_v35 = vsel %vm121_vm2, %v38_v32, 0  ;;  %v3703_v39 = vsel %vm121_vm2, %v39_v36, 0  ;;  %v42_v56 = vld [vmem:[%s4362_s1 + $0x60] sm:$0xf] }
  0x10   :  { %2698 = vmatmul.mubr.f32.vlgmr.msra.gmra.mrb[0].mxu0 %v3609_v11  ;;  %2736 = vmatprep.subr.mxu0 %v3534_v2  ;;  %v233_v37 = vand.u32 4294901760, %v3685_v34  ;;  %v3698_v38 = vand.u32 4294901760, %v3690_v35  ;;  %v3706_v40 = vsub.f32 %v126_v13, %v3616_v15  ;;  %v3717_v45 = vand.u32 4294901760, %v3703_v39 }
  0x11   :  { %2700 = vmatprep.mubr.msk.f32.mxu0 %vm3535_vm1, %v3534_v2  ;;  %2737 = vmatpush3.msra.mxu0 %v3598_v6  ;;  %v3722_v46 = vsel %vm121_vm2, %v40_v42, 0  ;;  %v3725_v47 = vsub.f32 %v129_v16, %v3628_v18  ;;  %v3743_v53 = vsel %vm121_vm2, %v41_v49, 0  ;;  %v3746_v54 = vsub.f32 %v132_v19, %v3637_v21  ;;  %v43_v6 = vld [vmem:[%s4363_s2] sm:$0xff] }
  0x12   :  { %2777 = vmatprep.subr.mxu0 %v3534_v2  ;;  %v234_v41 = vsub.f32 %v3685_v34, %v233_v37  ;;  %v243_v43 = vand.u32 4294901760, %v3706_v40  ;;  %v3738_v52 = vand.u32 4294901760, %v3722_v46  ;;  %v3759_v59 = vand.u32 4294901760, %v3743_v53 }
  0x13   :  { %v253_v50 = vand.u32 4294901760, %v3725_v47  ;;  %v263_v57 = vand.u32 4294901760, %v3746_v54  ;;  %v3764_v60 = vsel %vm121_vm2, %v42_v56, 0  ;;  %v3767_v61 = vsub.f32 %v135_v22, %v3646_v24 }
  0x14   :  { %2701 = vmatmul.mubr.f32.gmra.mrb[2].mxu0 %v3616_v15  ;;  %v235_v44 = vand.u32 4294901760, %v234_v41  ;;  %v244_v48 = vsub.f32 %v3706_v40, %v243_v43  ;;  %v3777_v1 = vand.u32 4294901760, %v3764_v60  ;;  %v3783_v3 = vsub.f32 %v3651_v25, %v3658_v27 }
  0x15   :  { %2703 = vmatprep.mubr.msk.f32.mxu0 %vm3535_vm1, %v3534_v2  ;;  %v254_v55 = vsub.f32 %v3725_v47, %v253_v50  ;;  %v264_v62 = vsub.f32 %v3746_v54, %v263_v57  ;;  %v273_v63 = vand.u32 4294901760, %v3767_v61  ;;  %v3796_v10 = vsub.f32 %v3663_v28, %v3670_v30 }
  0x16   :  { %2657 = vmatmul.mubr.f32.vlgmr.msra.gmra.mrb[0].mxu1 %v235_v44  ;;  %v245_v51 = vand.u32 4294901760, %v244_v48  ;;  %v283_v8 = vand.u32 4294901760, %v3783_v3  ;;  %v3810_v16 = vsub.f32 %v3675_v31, %v3682_v33  ;;  %v3824_v22 = vsub.f32 %v3690_v35, %v3698_v38 }
  0x17   :  { %2659 = vmatprep.mubr.msk.f32.mxu1 %vm3535_vm1, %v3534_v2  ;;  %v255_v58 = vand.u32 4294901760, %v254_v55  ;;  %v265_v0 = vand.u32 4294901760, %v264_v62  ;;  %v274_v5 = vsub.f32 %v3767_v61, %v273_v63  ;;  %v293_v13 = vand.u32 4294901760, %v3796_v10  ;;  %v54_v62 = vld [vmem:[%s4363_s2 + $0x58] sm:$0xff] }
  0x18   :  { %2704 = vmatmul.mubr.f32.gmra.mrb[4].mxu0 %v3628_v18  ;;  %v284_v12 = vsub.f32 %v3783_v3, %v283_v8  ;;  %v303_v19 = vand.u32 4294901760, %v3810_v16  ;;  %v313_v25 = vand.u32 4294901760, %v3824_v22  ;;  %v3837_v28 = vsub.f32 %v3703_v39, %v3717_v45 }
  0x19   :  { %2706 = vmatprep.mubr.msk.f32.mxu0 %vm3535_vm1, %v3534_v2  ;;  %v275_v9 = vand.u32 4294901760, %v274_v5  ;;  %v294_v17 = vsub.f32 %v3796_v10, %v293_v13  ;;  %v3850_v35 = vsub.f32 %v3722_v46, %v3738_v52  ;;  %v3863_v42 = vsub.f32 %v3743_v53, %v3759_v59  ;;  %v1147_v5 = vld [vmem:[%s4365_s4 + $0x18] sm:$0x1] }
  0x1a   :  { %2660 = vmatmul.mubr.f32.gmra.mrb[2].mxu1 %v245_v51  ;;  %v285_v14 = vand.u32 4294901760, %v284_v12  ;;  %v304_v23 = vsub.f32 %v3810_v16, %v303_v19  ;;  %v314_v29 = vsub.f32 %v3824_v22, %v313_v25  ;;  %v323_v31 = vand.u32 4294901760, %v3837_v28 }
  0x1b   :  { %2662 = vmatprep.mubr.msk.f32.mxu1 %vm3535_vm1, %v3534_v2  ;;  %v295_v20 = vand.u32 4294901760, %v294_v17  ;;  %v333_v39 = vand.u32 4294901760, %v3850_v35  ;;  %v343_v46 = vand.u32 4294901760, %v3863_v42  ;;  %v3876_v49 = vsub.f32 %v3764_v60, %v3777_v1  ;;  %v52_v60 = vld [vmem:[%s4363_s2 + $0x48] sm:$0xff] }
  0x1c   :  { %2707 = vmatmul.mubr.f32.gmra.mrb[6].mxu0 %v3637_v21  ;;  %v305_v26 = vand.u32 4294901760, %v304_v23  ;;  %v315_v32 = vand.u32 4294901760, %v314_v29  ;;  %v324_v36 = vsub.f32 %v3837_v28, %v323_v31  ;;  %vm1934_vm5 = vcmask 1040384  }
  0x1d   :  { %2709 = vmatprep.mubr.msk.f32.mxu0 %vm3535_vm1, %v3534_v2  ;;  %v334_v44 = vsub.f32 %v3850_v35, %v333_v39  ;;  %v344_v51 = vsub.f32 %v3863_v42, %v343_v46  ;;  %v353_v53 = vand.u32 4294901760, %v3876_v49 }
  0x1e   :  { %2663 = vmatmul.mubr.f32.gmra.mrb[4].mxu1 %v255_v58  ;;  %v325_v41 = vand.u32 4294901760, %v324_v36 }
  0x1f   :  { %2665 = vmatprep.mubr.msk.f32.mxu1 %vm3535_vm1, %v3534_v2  ;;  %v335_v48 = vand.u32 4294901760, %v334_v44  ;;  %v345_v55 = vand.u32 4294901760, %v344_v51  ;;  %v354_v56 = vsub.f32 %v3876_v49, %v353_v53 }
  0x20   :  { %2710 = vmatmul.mubr.f32.gmra.mrb[8].mxu0 %v3646_v24 }
  0x21   :  { %2712 = vmatprep.mubr.msk.f32.mxu0 %vm3535_vm1, %v3534_v2  ;;  %v355_v58 = vand.u32 4294901760, %v354_v56 }
  0x22   :  { %2666 = vmatmul.mubr.f32.gmra.mrb[6].mxu1 %v265_v0  ;;  %v1144_v0 = vld [vmem:[%s4365_s4] sm:$0xff] }
  0x23   :  { %2668 = vmatprep.mubr.msk.f32.mxu1 %vm3535_vm1, %v3534_v2 }
  0x24   :  { %2713 = vmatmul.mubr.f32.gmra.mrb[10].mxu0 %v3658_v27 }
  0x25   :  { %2715 = vmatprep.mubr.msk.f32.mxu0 %vm3535_vm1, %v3534_v2 }
  0x26   :  { %2669 = vmatmul.mubr.f32.gmra.mrb[8].mxu1 %v275_v9  ;;  %v1920_v9 = vld [vmem:[#allocation2] sm:$0x1] }
  0x27   :  { %2671 = vmatprep.mubr.msk.f32.mxu1 %vm3535_vm1, %v3534_v2 }
  0x28   :  { %2716 = vmatmul.mubr.f32.gmra.mrb[12].mxu0 %v3670_v30 }
  0x29   :  { %2718 = vmatprep.mubr.msk.f32.mxu0 %vm3535_vm1, %v3534_v2 }
  0x2a   :  { %2672 = vmatmul.mubr.f32.gmra.mrb[10].mxu1 %v285_v14 }
  0x2b   :  { %2674 = vmatprep.mubr.msk.f32.mxu1 %vm3535_vm1, %v3534_v2 }
  0x2c   :  { %2719 = vmatmul.mubr.f32.gmra.mrb[14].mxu0 %v3682_v33 }
  0x2d   :  { %2721 = vmatprep.mubr.msk.f32.mxu0 %vm3535_vm1, %v3534_v2 }
  0x2e   :  { %2675 = vmatmul.mubr.f32.gmra.mrb[12].mxu1 %v295_v20 }
  0x2f   :  { %2677 = vmatprep.mubr.msk.f32.mxu1 %vm3535_vm1, %v3534_v2 }
  0x30   :  { %2722 = vmatmul.mubr.f32.gmra.mrb[16].mxu0 %v3698_v38 }
  0x31   :  { %2724 = vmatprep.mubr.msk.f32.mxu0 %vm3535_vm1, %v3534_v2 }
  0x32   :  { %2678 = vmatmul.mubr.f32.gmra.mrb[14].mxu1 %v305_v26 }
  0x33   :  { %2680 = vmatprep.mubr.msk.f32.mxu1 %vm3535_vm1, %v3534_v2 }
  0x34   :  { %2725 = vmatmul.mubr.f32.gmra.mrb[18].mxu0 %v3717_v45 }
  0x35   :  { %2727 = vmatprep.mubr.msk.f32.mxu0 %vm3535_vm1, %v3534_v2 }
  0x36   :  { %2681 = vmatmul.mubr.f32.gmra.mrb[16].mxu1 %v315_v32 }
  0x37   :  { %2683 = vmatprep.mubr.msk.f32.mxu1 %vm3535_vm1, %v3534_v2 }
  0x38   :  { %2728 = vmatmul.mubr.f32.gmra.mrb[20].mxu0 %v3738_v52 }
  0x39   :  { %2730 = vmatprep.mubr.msk.f32.mxu0 %vm3535_vm1, %v3534_v2 }
  0x3a   :  { %2684 = vmatmul.mubr.f32.gmra.mrb[18].mxu1 %v325_v41 }
  0x3b   :  { %2686 = vmatprep.mubr.msk.f32.mxu1 %vm3535_vm1, %v3534_v2 }
  0x3c   :  { %2731 = vmatmul.mubr.f32.gmra.mrb[22].mxu0 %v3759_v59 }
  0x3d   :  { %2733 = vmatprep.mubr.msk.f32.mxu0 %vm3535_vm1, %v3534_v2 }
  0x3e   :  { %2687 = vmatmul.mubr.f32.gmra.mrb[20].mxu1 %v335_v48 }
  0x3f   :  { %2689 = vmatprep.mubr.msk.f32.mxu1 %vm3535_vm1, %v3534_v2 }
  0x40   :  { %2734 = vmatmul.mubr.f32.gmra.mrb[24].mxu0 %v3777_v1 }
  0x41   :  { %2738 = vmatprep.mubr.msk.f32.mxu0 %vm3535_vm1, %v3534_v2 }
  0x42   :  { %2690 = vmatmul.mubr.f32.gmra.mrb[22].mxu1 %v345_v55 }
  0x43   :  { %2692 = vmatprep.mubr.msk.f32.mxu1 %vm3535_vm1, %v3534_v2 }
  0x44   :  { %2739 = vmatmul.mubr.f32.vlgmr.msra.gmra.mrb[0].mxu0 %v3685_v34  ;;  %v3536_v34 = vmov 0  }
  0x45   :  { %2741 = vmatprep.mubr.msk.f32.mxu0 %vm3535_vm1, %v3534_v2  ;;  %2778 = vmatpush3.msra.mxu0 %v3589_v4 }
  0x46   :  { %2818 = vmatprep.subr.mxu0 %v3534_v2  ;;  %2693 = vmatmul.mubr.f32.gmra.mrb[24].mxu1 %v355_v58 }
  0x47   :  { %3508 = vset.pattern.permute.xlu0 %v3536_v34  ;;  %3509 = vset.pattern.permute.xlu1 %v3536_v34 }
  0x48   :  { %2742 = vmatmul.mubr.f32.gmra.mrb[2].mxu0 %v3706_v40  ;;  %58 = vperm.xlu0 %3508, %v43_v6   ;;  %v46_v40 = vld [vmem:[%s4363_s2 + $0x18] sm:$0xff] }
  0x49   :  { %2744 = vmatprep.mubr.msk.f32.mxu0 %vm3535_vm1, %v3534_v2 }
  0x4c   :  { %2745 = vmatmul.mubr.f32.gmra.mrb[4].mxu0 %v3725_v47  ;;  %v48_v47 = vld [vmem:[%s4363_s2 + $0x28] sm:$0xff] }
  0x4d   :  { %2747 = vmatprep.mubr.msk.f32.mxu0 %vm3535_vm1, %v3534_v2 }
  0x50   :  { %2748 = vmatmul.mubr.f32.gmra.mrb[6].mxu0 %v3746_v54  ;;  %v50_v54 = vld [vmem:[%s4363_s2 + $0x38] sm:$0xff] }
  0x51   :  { %2750 = vmatprep.mubr.msk.f32.mxu0 %vm3535_vm1, %v3534_v2 }
  0x54   :  { %2751 = vmatmul.mubr.f32.gmra.mrb[8].mxu0 %v3767_v61  ;;  %v53_v61 = vld [vmem:[%s4363_s2 + $0x50] sm:$0xff] }
  0x55   :  { %2753 = vmatprep.mubr.msk.f32.mxu0 %vm3535_vm1, %v3534_v2 }
  0x58   :  { %2754 = vmatmul.mubr.f32.gmra.mrb[10].mxu0 %v3783_v3  ;;  %v1145_v3 = vld [vmem:[%s4365_s4 + $0x8] sm:$0xff] }
  0x59   :  { %2756 = vmatprep.mubr.msk.f32.mxu0 %vm3535_vm1, %v3534_v2 }
  0x5c   :  { %2757 = vmatmul.mubr.f32.gmra.mrb[12].mxu0 %v3796_v10 }
  0x5d   :  { %2759 = vmatprep.mubr.msk.f32.mxu0 %vm3535_vm1, %v3534_v2 }
  0x60   :  { %2760 = vmatmul.mubr.f32.gmra.mrb[14].mxu0 %v3810_v16 }
  0x61   :  { %2762 = vmatprep.mubr.msk.f32.mxu0 %vm3535_vm1, %v3534_v2 }
  0x64   :  { %2763 = vmatmul.mubr.f32.gmra.mrb[16].mxu0 %v3824_v22 }
  0x65   :  { %2765 = vmatprep.mubr.msk.f32.mxu0 %vm3535_vm1, %v3534_v2 }
  0x68   :  { %2766 = vmatmul.mubr.f32.gmra.mrb[18].mxu0 %v3837_v28  ;;  %v1140_v28 = vld [vmem:[%s4364_s3] sm:$0xff] }
  0x69   :  { %2768 = vmatprep.mubr.msk.f32.mxu0 %vm3535_vm1, %v3534_v2  ;;  %v1170_v29 = vsel %vm1168_vm3, %v1140_v28, 0 }
  0x6c   :  { %2769 = vmatmul.mubr.f32.gmra.mrb[20].mxu0 %v3850_v35 }
  0x6d   :  { %2771 = vmatprep.mubr.msk.f32.mxu0 %vm3535_vm1, %v3534_v2 }
  0x70   :  { %2772 = vmatmul.mubr.f32.gmra.mrb[22].mxu0 %v3863_v42 }
  0x71   :  { %2774 = vmatprep.mubr.msk.f32.mxu0 %vm3535_vm1, %v3534_v2 }
  0x74   :  { %2775 = vmatmul.mubr.f32.gmra.mrb[24].mxu0 %v3876_v49 }
  0x75   :  { %2779 = vmatprep.mubr.msk.f32.mxu0 %vm3535_vm1, %v3534_v2 }
  0x78   :  { %2780 = vmatmul.mubr.f32.vlgmr.msra.gmra.mrb[0].mxu0 %v233_v37  ;;  %v44_v37 = vld [vmem:[%s4363_s2 + $0x8] sm:$0xff] }
  0x79   :  { %2782 = vmatprep.mubr.msk.f32.mxu0 %vm3535_vm1, %v3534_v2  ;;  %2819 = vmatpush3.msra.mxu0 %v364_v7  ;;  %v45_v7 = vld [vmem:[%s4363_s2 + $0x10] sm:$0xff] }
  0x7a   :  { %2859 = vmatprep.subr.mxu0 %v3534_v2  ;;  %68 = vperm.xlu1 %3509, %v45_v7  }
  0x7b   :  { %63 = vperm.xlu0 %3508, %v44_v37  }
  0x7c   :  { %2783 = vmatmul.mubr.f32.gmra.mrb[2].mxu0 %v243_v43  ;;  %v47_v43 = vld [vmem:[%s4363_s2 + $0x20] sm:$0xff] }
  0x7d   :  { %2785 = vmatprep.mubr.msk.f32.mxu0 %vm3535_vm1, %v3534_v2 }
  0x7e   :  { %73 = vperm.xlu1 %3509, %v46_v40  }
  0x7f   :  { %78 = vperm.xlu0 %3508, %v47_v43  }
  0x80   :  { %2786 = vmatmul.mubr.f32.gmra.mrb[4].mxu0 %v253_v50  ;;  %v49_v50 = vld [vmem:[%s4363_s2 + $0x30] sm:$0xff] }
  0x81   :  { %2788 = vmatprep.mubr.msk.f32.mxu0 %vm3535_vm1, %v3534_v2 }
  0x82   :  { %83 = vperm.xlu1 %3509, %v48_v47  }
  0x83   :  { %88 = vperm.xlu0 %3508, %v49_v50  }
  0x84   :  { %2789 = vmatmul.mubr.f32.gmra.mrb[6].mxu0 %v263_v57  ;;  %v51_v57 = vld [vmem:[%s4363_s2 + $0x40] sm:$0xff] }
  0x85   :  { %2791 = vmatprep.mubr.msk.f32.mxu0 %vm3535_vm1, %v3534_v2 }
  0x86   :  { %93 = vperm.xlu1 %3509, %v50_v54  }
  0x87   :  { %98 = vperm.xlu0 %3508, %v51_v57  }
  0x88   :  { %2792 = vmatmul.mubr.f32.gmra.mrb[8].mxu0 %v273_v63  ;;  %v55_v63 = vld [vmem:[%s4363_s2 + $0x60] sm:$0xf] }
  0x89   :  { %2794 = vmatprep.mubr.msk.f32.mxu0 %vm3535_vm1, %v3534_v2 }
  0x8a   :  { %103 = vperm.xlu1 %3509, %v52_v60  }
  0x8b   :  { %108 = vperm.xlu0 %3508, %v53_v61  }
  0x8c   :  { %2795 = vmatmul.mubr.f32.gmra.mrb[10].mxu0 %v283_v8  ;;  %v1146_v8 = vld [vmem:[%s4365_s4 + $0x10] sm:$0xff] }
  0x8d   :  { %2797 = vmatprep.mubr.msk.f32.mxu0 %vm3535_vm1, %v3534_v2 }
  0x8e   :  { %113 = vperm.xlu1 %3509, %v54_v62  }
  0x8f   :  { %118 = vperm.xlu0 %3508, %v55_v63  }
  0x90   :  { %2798 = vmatmul.mubr.f32.gmra.mrb[12].mxu0 %v293_v13 }
  0x91   :  { %2800 = vmatprep.mubr.msk.f32.mxu0 %vm3535_vm1, %v3534_v2 }
  0x92   :  { %1150 = vperm.xlu1 %3509, %v1144_v0  }
  0x93   :  { %1155 = vperm.xlu0 %3508, %v1145_v3  }
  0x94   :  { %2801 = vmatmul.mubr.f32.gmra.mrb[14].mxu0 %v303_v19 }
  0x95   :  { %2803 = vmatprep.mubr.msk.f32.mxu0 %vm3535_vm1, %v3534_v2 }
  0x96   :  { %1165 = vperm.xlu1 %3509, %v1147_v5  }
  0x97   :  { %1160 = vperm.xlu0 %3508, %v1146_v8  }
  0x98   :  { %2804 = vmatmul.mubr.f32.gmra.mrb[16].mxu0 %v313_v25 }
  0x99   :  { %2806 = vmatprep.mubr.msk.f32.mxu0 %vm3535_vm1, %v3534_v2 }
  0x9a   :  { %1923 = vperm.xlu1 %3509, %v1920_v9  }
  0x9c   :  { %2807 = vmatmul.mubr.f32.gmra.mrb[18].mxu0 %v323_v31  ;;  %v4113_v31 = vand.u32 4294901760, %v1170_v29 }
  0x9d   :  { %2809 = vmatprep.mubr.msk.f32.mxu0 %vm3535_vm1, %v3534_v2 }
  0x9e   :  { %v4116_v32 = vsub.f32 %v1170_v29, %v4113_v31 }
  0xa0   :  { %2810 = vmatmul.mubr.f32.gmra.mrb[20].mxu0 %v333_v39  ;;  %v1264_v35 = vand.u32 4294901760, %v4116_v32 }
  0xa1   :  { %2812 = vmatprep.mubr.msk.f32.mxu0 %vm3535_vm1, %v3534_v2 }
  0xa2   :  { %v1265_v36 = vsub.f32 %v4116_v32, %v1264_v35 }
  0xa4   :  { %2813 = vmatmul.mubr.f32.gmra.mrb[22].mxu0 %v343_v46  ;;  %v1266_v39 = vand.u32 4294901760, %v1265_v36 }
  0xa5   :  { %2815 = vmatprep.mubr.msk.f32.mxu0 %vm3535_vm1, %v3534_v2 }
  0xa6   :  { %2926 = vmatprep.mubr.f32.mxu1 %v1266_v39 }
  0xa8   :  { %2816 = vmatmul.mubr.f32.gmra.mrb[24].mxu0 %v353_v53 }
  0xa9   :  { %2820 = vmatprep.mubr.msk.f32.mxu0 %vm3535_vm1, %v3534_v2 }
  0xac   :  { %2821 = vmatmul.mubr.f32.vlgmr.msra.gmra.mrb[0].mxu0 %v3609_v11 }
  0xad   :  { %2823 = vmatprep.mubr.msk.f32.mxu0 %vm3535_vm1, %v3534_v2  ;;  %2860 = vmatpush3.msra.mxu0 %v3589_v4 }
  0xb0   :  { %2824 = vmatmul.mubr.f32.gmra.mrb[2].mxu0 %v3616_v15 }
  0xb1   :  { %2826 = vmatprep.mubr.msk.f32.mxu0 %vm3535_vm1, %v3534_v2 }
  0xb4   :  { %2827 = vmatmul.mubr.f32.gmra.mrb[4].mxu0 %v3628_v18 }
  0xb5   :  { %2829 = vmatprep.mubr.msk.f32.mxu0 %vm3535_vm1, %v3534_v2 }
  0xb8   :  { %2830 = vmatmul.mubr.f32.gmra.mrb[6].mxu0 %v3637_v21 }
  0xb9   :  { %2832 = vmatprep.mubr.msk.f32.mxu0 %vm3535_vm1, %v3534_v2 }
  0xbc   :  { %2833 = vmatmul.mubr.f32.gmra.mrb[8].mxu0 %v3646_v24 }
  0xbd   :  { %2835 = vmatprep.mubr.msk.f32.mxu0 %vm3535_vm1, %v3534_v2 }
  0xc0   :  { %2836 = vmatmul.mubr.f32.gmra.mrb[10].mxu0 %v3658_v27 }
  0xc1   :  { %2838 = vmatprep.mubr.msk.f32.mxu0 %vm3535_vm1, %v3534_v2 }
  0xc4   :  { %2839 = vmatmul.mubr.f32.gmra.mrb[12].mxu0 %v3670_v30 }
  0xc5   :  { %2841 = vmatprep.mubr.msk.f32.mxu0 %vm3535_vm1, %v3534_v2 }
  0xc7   :  { %v59_v41 = vpop.permute.xlu0 %58 }
  0xc8   :  { %2842 = vmatmul.mubr.f32.gmra.mrb[14].mxu0 %v3682_v33 }
  0xc9   :  { %2844 = vmatprep.mubr.msk.f32.mxu0 %vm3535_vm1, %v3534_v2 }
  0xcc   :  { %2845 = vmatmul.mubr.f32.gmra.mrb[16].mxu0 %v3698_v38 }
  0xcd   :  { %2847 = vmatprep.mubr.msk.f32.mxu0 %vm3535_vm1, %v3534_v2 }
  0xd0   :  { %2848 = vmatmul.mubr.f32.gmra.mrb[18].mxu0 %v3717_v45 }
  0xd1   :  { %2850 = vmatprep.mubr.msk.f32.mxu0 %vm3535_vm1, %v3534_v2 }
  0xd4   :  { %2851 = vmatmul.mubr.f32.gmra.mrb[20].mxu0 %v3738_v52 }
  0xd5   :  { %2853 = vmatprep.mubr.msk.f32.mxu0 %vm3535_vm1, %v3534_v2 }
  0xd8   :  { %2854 = vmatmul.mubr.f32.gmra.mrb[22].mxu0 %v3759_v59 }
  0xd9   :  { %2856 = vmatprep.mubr.msk.f32.mxu0 %vm3535_vm1, %v3534_v2 }
  0xdc   :  { %2857 = vmatmul.mubr.f32.gmra.mrb[24].mxu0 %v3777_v1 }
  0xdd   :  { %2861 = vmatprep.mubr.msk.f32.mxu0 %vm3535_vm1, %v3534_v2 }
  0xe0   :  { %2862 = vmatmul.mubr.f32.vlgmr.msra.gmra.mrb[0].mxu0 %v3609_v11 }
  0xe1   :  { %2864 = vmatprep.mubr.msk.f32.mxu0 %vm3535_vm1, %v3534_v2 }
  0xe4   :  { %2865 = vmatmul.mubr.f32.gmra.mrb[2].mxu0 %v3616_v15 }
  0xe5   :  { %2867 = vmatprep.mubr.msk.f32.mxu0 %vm3535_vm1, %v3534_v2 }
  0xe8   :  { %2868 = vmatmul.mubr.f32.gmra.mrb[4].mxu0 %v3628_v18 }
  0xe9   :  { %2870 = vmatprep.mubr.msk.f32.mxu0 %vm3535_vm1, %v3534_v2  ;;  %v237_v4 = vpop.f32.mrb[0].mxu1 }
  0xea   :  { %v2658_v11 = vpop.f32.mrb[1].mxu1  ;;  %v238_v42 = vadd.f32 %v237_v4, %v59_v41 }
  0xec   :  { %2871 = vmatmul.mubr.f32.gmra.mrb[6].mxu0 %v3637_v21 }
  0xed   :  { %2873 = vmatprep.mubr.msk.f32.mxu0 %vm3535_vm1, %v3534_v2  ;;  %v247_v15 = vpop.f32.mrb[2].mxu1 }
  0xee   :  { %v2661_v18 = vpop.f32.mrb[3].mxu1 }
  0xf0   :  { %2874 = vmatmul.mubr.f32.gmra.mrb[8].mxu0 %v3646_v24 }
  0xf1   :  { %2876 = vmatprep.mubr.msk.f32.mxu0 %vm3535_vm1, %v3534_v2  ;;  %v257_v21 = vpop.f32.mrb[4].mxu1 }
  0xf2   :  { %v2664_v24 = vpop.f32.mrb[5].mxu1 }
  0xf4   :  { %2877 = vmatmul.mubr.f32.gmra.mrb[10].mxu0 %v3658_v27 }
  0xf5   :  { %2879 = vmatprep.mubr.msk.f32.mxu0 %vm3535_vm1, %v3534_v2  ;;  %v267_v27 = vpop.f32.mrb[6].mxu1 }
  0xf8   :  { %2880 = vmatmul.mubr.f32.gmra.mrb[12].mxu0 %v3670_v30  ;;  %v2667_v30 = vpop.f32.mrb[7].mxu1 }
  0xf9   :  { %2882 = vmatprep.mubr.msk.f32.mxu0 %vm3535_vm1, %v3534_v2  ;;  %v69_v53 = vpop.permute.xlu1 %68 }
  0xfa   :  { %v64_v44 = vpop.permute.xlu0 %63  ;;  %v258_v58 = vadd.f32 %v257_v21, %v69_v53 }
  0xfb   :  { %v248_v48 = vadd.f32 %v247_v15, %v64_v44 }
  0xfc   :  { %2883 = vmatmul.mubr.f32.gmra.mrb[14].mxu0 %v3682_v33  ;;  %v277_v33 = vpop.f32.mrb[8].mxu1 }
  0xfd   :  { %2885 = vmatprep.mubr.msk.f32.mxu0 %vm3535_vm1, %v3534_v2  ;;  %v74_v43 = vpop.permute.xlu1 %73 }
  0xfe   :  { %v268_v50 = vadd.f32 %v267_v27, %v74_v43  ;;  %v79_v3 = vpop.permute.xlu0 %78 }
  0xff   :  { %v278_v9 = vadd.f32 %v277_v33, %v79_v3 }
 0x100   :  { %2886 = vmatmul.mubr.f32.gmra.mrb[16].mxu0 %v3698_v38  ;;  %v2670_v38 = vpop.f32.mrb[9].mxu1 }
 0x101   :  { %2888 = vmatprep.mubr.msk.f32.mxu0 %vm3535_vm1, %v3534_v2  ;;  %v84_v24 = vpop.permute.xlu1 %83 }
 0x102   :  { %v89_v44 = vpop.permute.xlu0 %88 }
 0x104   :  { %2889 = vmatmul.mubr.f32.gmra.mrb[18].mxu0 %v3717_v45  ;;  %v4093_v45 = vpop.f32.mrb[10].mxu1 }
 0x105   :  { %2891 = vmatprep.mubr.msk.f32.mxu0 %vm3535_vm1, %v3534_v2 }
 0x108   :  { %2892 = vmatmul.mubr.f32.gmra.mrb[20].mxu0 %v3738_v52  ;;  %v2673_v52 = vpop.f32.mrb[11].mxu1 }
 0x109   :  { %2894 = vmatprep.mubr.msk.f32.mxu0 %vm3535_vm1, %v3534_v2  ;;  %v4095_v10 = vpop.f32.mrb[12].mxu1 }
 0x10a   :  { %v2676_v12 = vpop.f32.mrb[13].mxu1  ;;  %v298_v53 = vadd.f32 %v4095_v10, %v89_v44 }
 0x10b   :  { %v4097_v13 = vpop.f32.mrb[14].mxu1  ;;  %v288_v12 = vadd.f32 %v4093_v45, %v84_v24 }
 0x10c   :  { %2895 = vmatmul.mubr.f32.gmra.mrb[22].mxu0 %v3759_v59  ;;  %v2679_v59 = vpop.f32.mrb[15].mxu1 }
 0x10d   :  { %2897 = vmatprep.mubr.msk.f32.mxu0 %vm3535_vm1, %v3534_v2  ;;  %v4099_v14 = vpop.f32.mrb[16].mxu1 }
 0x10e   :  { %v2682_v16 = vpop.f32.mrb[17].mxu1 }
 0x10f   :  { %v4101_v17 = vpop.f32.mrb[18].mxu1 }
 0x110   :  { %2898 = vmatmul.mubr.f32.gmra.mrb[24].mxu0 %v3777_v1  ;;  %v2685_v19 = vpop.f32.mrb[19].mxu1 }
 0x111   :  { %v4103_v1 = vpop.f32.mrb[20].mxu1 }
 0x112   :  { %v2688_v20 = vpop.f32.mrb[21].mxu1 }
 0x115   :  { %v4105_v22 = vpop.f32.mrb[22].mxu1 }
 0x116   :  { %v2691_v23 = vpop.f32.mrb[23].mxu1 }
 0x119   :  { %v4107_v25 = vpop.f32.mrb[24].mxu1 }
 0x11a   :  { %v2694_v26 = vpop.f32.mrb[25].mxu1 }
 0x1b3   :  { %v1051_v46 = vpop.f32.mrb[0].mxu0 }
 0x1b4   :  { %v3339_v49 = vadd.f32 %v1051_v46, %v238_v42  ;;  %v2863_v51 = vpop.f32.mrb[1].mxu0 }
 0x1b6   :  { %v1127_v55 = vmax.f32 %v3339_v49, 0.0 }
 0x1b7   :  { %v1057_v56 = vpop.f32.mrb[2].mxu0 }
 0x1b8   :  { %v1185_v6 = vand.u32 4294901760, %v1127_v55  ;;  %v3341_v7 = vadd.f32 %v1057_v56, %v248_v48  ;;  %v2866_v34 = vpop.f32.mrb[3].mxu0 }
 0x1ba   :  { %v1304_v37 = vsub.f32 %v1127_v55, %v1185_v6  ;;  %v1128_v40 = vmax.f32 %v3341_v7, 0.0 }
 0x1bb   :  { %v1063_v47 = vpop.f32.mrb[4].mxu0 }
 0x1bc   :  { %v1305_v54 = vand.u32 4294901760, %v1304_v37  ;;  %v1188_v57 = vand.u32 4294901760, %v1128_v40  ;;  %v3343_v60 = vadd.f32 %v1063_v47, %v258_v58  ;;  %v2869_v61 = vpop.f32.mrb[5].mxu0 }
 0x1be   :  { %v4122_v62 = vpack.c.bf16 %v1188_v57, %v1185_v6  ;;  %v1311_v63 = vsub.f32 %v1128_v40, %v1188_v57  ;;  %v1129_v0 = vmax.f32 %v3343_v60, 0.0  ;;  %v1306_v8 = vsub.f32 %v1304_v37, %v1305_v54 }
 0x1bf   :  { %v1069_v5 = vpop.f32.mrb[6].mxu0 }
 0x1c0   :  { %v1312_v4 = vand.u32 4294901760, %v1311_v63  ;;  %v1191_v11 = vand.u32 4294901760, %v1129_v0  ;;  %v3345_v15 = vadd.f32 %v1069_v5, %v268_v50  ;;  %v2872_v18 = vpop.f32.mrb[7].mxu0  ;;  %3159 = vmatprep.subr.bf16.mxu1 %v4122_v62  ;;  %v4126_v21 = vpack.c.bf16 %v1311_v63, %v1304_v37  ;;  %v94_v37 = vpop.permute.xlu1 %93 }
 0x1c1   :  { %3161 = vmatpush3.bf16.msra.mxu1 %v4122_v62  ;;  %v1307_v33 = vand.u32 4294901760, %v1306_v8  ;;  %v308_v57 = vadd.f32 %v4097_v13, %v94_v37  ;;  %v99_v5 = vpop.permute.xlu0 %98 }
 0x1c2   :  { %v1318_v27 = vsub.f32 %v1129_v0, %v1191_v11  ;;  %v1130_v30 = vmax.f32 %v3345_v15, 0.0  ;;  %v1313_v38 = vsub.f32 %v1311_v63, %v1312_v4  ;;  %v4128_v52 = vpack.c.bf16 %v1312_v4, %v1305_v54 }
 0x1c3   :  { %v1075_v59 = vpop.f32.mrb[8].mxu0  ;;  %v318_v18 = vadd.f32 %v4099_v14, %v99_v5  ;;  %v1142_v14 = vld [vmem:[%s4364_s3 + $0x10] sm:$0xff] }
 0x1c4   :  { %v1319_v16 = vand.u32 4294901760, %v1318_v27  ;;  %v1194_v19 = vand.u32 4294901760, %v1130_v30  ;;  %v3347_v20 = vadd.f32 %v1075_v59, %v278_v9  ;;  %v2875_v23 = vpop.f32.mrb[9].mxu0  ;;  %v1314_v26 = vand.u32 4294901760, %v1313_v38 }
 0x1c6   :  { %v4131_v28 = vpack.c.bf16 %v1194_v19, %v1191_v11  ;;  %v1325_v29 = vsub.f32 %v1130_v30, %v1194_v19  ;;  %v1131_v36 = vmax.f32 %v3347_v20, 0.0  ;;  %v4133_v39 = vpack.c.bf16 %v1314_v26, %v1307_v33  ;;  %v104_v33 = vpop.permute.xlu1 %103 }
 0x1c7   :  { %v1081_v41 = vpop.f32.mrb[10].mxu0  ;;  %v1320_v42 = vsub.f32 %v1318_v27, %v1319_v16 }
 0x1c8   :  { %v1326_v46 = vand.u32 4294901760, %v1325_v29  ;;  %v1197_v48 = vand.u32 4294901760, %v1131_v36  ;;  %v3349_v49 = vadd.f32 %v1081_v41, %v288_v12  ;;  %v2878_v45 = vpop.f32.mrb[11].mxu0  ;;  %3163 = vmatprep.subr.bf16.mxu1 %v4131_v28  ;;  %v4136_v51 = vpack.c.bf16 %v1325_v29, %v1318_v27  ;;  %v1141_v27 = vld [vmem:[%s4364_s3 + $0x8] sm:$0xff] }
 0x1c9   :  { %3165 = vmatpush3.bf16.msra.mxu1 %v4131_v28  ;;  %v1321_v34 = vand.u32 4294901760, %v1320_v42 }
 0x1ca   :  { %v1332_v55 = vsub.f32 %v1131_v36, %v1197_v48  ;;  %v1132_v56 = vmax.f32 %v3349_v49, 0.0  ;;  %v1327_v58 = vsub.f32 %v1325_v29, %v1326_v46  ;;  %v4140_v6 = vpack.c.bf16 %v1326_v46, %v1319_v16 }
 0x1cb   :  { %v1087_v7 = vpop.f32.mrb[12].mxu0  ;;  %v328_v29 = vadd.f32 %v4101_v17, %v104_v33  ;;  %v1173_v36 = vsel %vm1168_vm3, %v1141_v27, 0 }
 0x1cc   :  { %v1333_v40 = vand.u32 4294901760, %v1332_v55  ;;  %v1200_v43 = vand.u32 4294901760, %v1132_v56  ;;  %v3351_v47 = vadd.f32 %v1087_v7, %v298_v53  ;;  %v2881_v50 = vpop.f32.mrb[13].mxu0  ;;  %v1328_v54 = vand.u32 4294901760, %v1327_v58 }
 0x1cd   :  { %v1176_v53 = vsel %vm1168_vm3, %v1142_v14, 0 }
 0x1ce   :  { %v4143_v60 = vpack.c.bf16 %v1200_v43, %v1197_v48  ;;  %v1339_v10 = vsub.f32 %v1132_v56, %v1200_v43  ;;  %v1133_v61 = vmax.f32 %v3351_v47, 0.0  ;;  %v4145_v63 = vpack.c.bf16 %v1328_v54, %v1321_v34  ;;  %v1143_v48 = vld [vmem:[%s4364_s3 + $0x18] sm:$0x1] }
 0x1cf   :  { %v1093_v0 = vpop.f32.mrb[14].mxu0  ;;  %v1334_v3 = vsub.f32 %v1332_v55, %v1333_v40  ;;  %v1179_v43 = vsel %vm1168_vm3, %v1143_v48, 0 }
 0x1d0   :  { %v1340_v8 = vand.u32 4294901760, %v1339_v10  ;;  %v1203_v9 = vand.u32 4294901760, %v1133_v61  ;;  %v3353_v4 = vadd.f32 %v1093_v0, %v308_v57  ;;  %v2884_v11 = vpop.f32.mrb[15].mxu0  ;;  %3167 = vmatprep.subr.bf16.mxu1 %v4143_v60  ;;  %v4148_v15 = vpack.c.bf16 %v1339_v10, %v1332_v55  ;;  %v109_v55 = vpop.permute.xlu0 %108 }
 0x1d1   :  { %3169 = vmatpush3.bf16.msra.mxu1 %v4143_v60  ;;  %v1335_v59 = vand.u32 4294901760, %v1334_v3  ;;  %v338_v37 = vadd.f32 %v4103_v1, %v109_v55  ;;  %v4180_v0 = vand.u32 4294901760, %v1176_v53  ;;  %v114_v3 = vpop.permute.xlu1 %113 }
 0x1d2   :  { %v1346_v13 = vsub.f32 %v1133_v61, %v1203_v9  ;;  %v1134_v24 = vmax.f32 %v3353_v4, 0.0  ;;  %v1341_v30 = vsub.f32 %v1339_v10, %v1340_v8  ;;  %v4155_v38 = vpack.c.bf16 %v1340_v8, %v1333_v40 }
 0x1d3   :  { %v1099_v12 = vpop.f32.mrb[16].mxu0  ;;  %v4175_v40 = vand.u32 4294901760, %v1173_v36  ;;  %v348_v11 = vadd.f32 %v4105_v22, %v114_v3 }
 0x1d4   :  { %v1347_v16 = vand.u32 4294901760, %v1346_v13  ;;  %v1206_v19 = vand.u32 4294901760, %v1134_v24  ;;  %v3355_v20 = vadd.f32 %v1099_v12, %v318_v18  ;;  %v2887_v23 = vpop.f32.mrb[17].mxu0  ;;  %v1342_v26 = vand.u32 4294901760, %v1341_v30 }
 0x1d5   :  { %v4184_v18 = vsub.f32 %v1173_v36, %v4175_v40 }
 0x1d6   :  { %v4162_v41 = vpack.c.bf16 %v1206_v19, %v1203_v9  ;;  %v1353_v42 = vsub.f32 %v1134_v24, %v1206_v19  ;;  %v1135_v44 = vmax.f32 %v3355_v20, 0.0  ;;  %v4164_v46 = vpack.c.bf16 %v1342_v26, %v1335_v59  ;;  %v119_v19 = vpop.permute.xlu0 %118 }
 0x1d7   :  { %v1105_v49 = vpop.f32.mrb[18].mxu0  ;;  %v1348_v45 = vsub.f32 %v1346_v13, %v1347_v16  ;;  %v1274_v36 = vand.u32 4294901760, %v4184_v18 }
 0x1d8   :  { %v1354_v56 = vand.u32 4294901760, %v1353_v42  ;;  %v1209_v58 = vand.u32 4294901760, %v1135_v44  ;;  %v3357_v17 = vadd.f32 %v1105_v49, %v328_v29  ;;  %v2890_v7 = vpop.f32.mrb[19].mxu0  ;;  %3171 = vmatprep.subr.bf16.mxu1 %v4162_v41  ;;  %v4171_v34 = vpack.c.bf16 %v1353_v42, %v1346_v13 }
 0x1d9   :  { %3173 = vmatpush3.bf16.msra.mxu1 %v4162_v41  ;;  %v1349_v61 = vand.u32 4294901760, %v1348_v45  ;;  %v4186_v13 = vand.u32 4294901760, %v1179_v43  ;;  %v358_v29 = vadd.f32 %v4107_v25, %v119_v19 }
 0x1da   :  { %v1360_v47 = vsub.f32 %v1135_v44, %v1209_v58  ;;  %v1136_v50 = vmax.f32 %v3357_v17, 0.0  ;;  %v1355_v54 = vsub.f32 %v1353_v42, %v1354_v56  ;;  %v4178_v57 = vpack.c.bf16 %v1354_v56, %v1347_v16 }
 0x1db   :  { %v1111_v10 = vpop.f32.mrb[20].mxu0  ;;  %v4193_v16 = vsub.f32 %v1176_v53, %v4180_v0  ;;  %v4202_v42 = vsub.f32 %v1179_v43, %v4186_v13 }
 0x1dc   :  { %v1361_v5 = vand.u32 4294901760, %v1360_v47  ;;  %v1212_v8 = vand.u32 4294901760, %v1136_v50  ;;  %v3359_v9 = vadd.f32 %v1111_v10, %v338_v37  ;;  %v2893_v1 = vpop.f32.mrb[21].mxu0  ;;  %v1356_v4 = vand.u32 4294901760, %v1355_v54 }
 0x1dd   :  { %v1284_v56 = vand.u32 4294901760, %v4193_v16  ;;  %v1294_v43 = vand.u32 4294901760, %v4202_v42 }
 0x1de   :  { %v4188_v24 = vpack.c.bf16 %v1212_v8, %v1209_v58  ;;  %v1367_v27 = vsub.f32 %v1136_v50, %v1212_v8  ;;  %v1137_v30 = vmax.f32 %v3359_v9, 0.0  ;;  %v4190_v12 = vpack.c.bf16 %v1356_v4, %v1349_v61 }
 0x1df   :  { %v1117_v59 = vpop.f32.mrb[22].mxu0  ;;  %v1362_v33 = vsub.f32 %v1360_v47, %v1361_v5  ;;  %v1285_v3 = vsub.f32 %v4193_v16, %v1284_v56 }
 0x1e0   :  { %v1368_v20 = vand.u32 4294901760, %v1367_v27  ;;  %v1215_v23 = vand.u32 4294901760, %v1137_v30  ;;  %v3361_v22 = vadd.f32 %v1117_v59, %v348_v11  ;;  %v2896_v26 = vpop.f32.mrb[23].mxu0  ;;  %3175 = vmatprep.subr.bf16.mxu1 %v4188_v24  ;;  %v4196_v14 = vpack.c.bf16 %v1367_v27, %v1360_v47 }
 0x1e1   :  { %3177 = vmatpush3.bf16.msra.mxu1 %v4188_v24  ;;  %v1363_v55 = vand.u32 4294901760, %v1362_v33  ;;  %v1275_v47 = vsub.f32 %v4184_v18, %v1274_v36  ;;  %v1286_v33 = vand.u32 4294901760, %v1285_v3 }
 0x1e2   :  { %v1374_v44 = vsub.f32 %v1137_v30, %v1215_v23  ;;  %v1138_v48 = vmax.f32 %v3361_v22, 0.0  ;;  %v1369_v49 = vsub.f32 %v1367_v27, %v1368_v20  ;;  %v4204_v45 = vpack.c.bf16 %v1368_v20, %v1361_v5 }
 0x1e3   :  { %v1123_v53 = vpop.f32.mrb[24].mxu0  ;;  %v1276_v11 = vand.u32 4294901760, %v1275_v47  ;;  %v1295_v30 = vsub.f32 %v4202_v42, %v1294_v43 }
 0x1e4   :  { %v1375_v58 = vand.u32 4294901760, %v1374_v44  ;;  %v1218_v17 = vand.u32 4294901760, %v1138_v48  ;;  %v3363_v7 = vadd.f32 %v1123_v53, %v358_v29  ;;  %v2899_v25 = vpop.f32.mrb[25].mxu0  ;;  %v1370_v37 = vand.u32 4294901760, %v1369_v49 }
 0x1e5   :  { %v1296_v22 = vand.u32 4294901760, %v1295_v30 }
 0x1e6   :  { %v4211_v50 = vpack.c.bf16 %v1218_v17, %v1215_v23  ;;  %v1381_v54 = vsub.f32 %v1138_v48, %v1218_v17  ;;  %v1139_v10 = vmax.f32 %v3363_v7, 0.0  ;;  %v3198_v61 = vpack.c.bf16 %v1370_v37, %v1363_v55 }
 0x1e7   :  { %v1376_v9 = vsub.f32 %v1374_v44, %v1375_v58 }
 0x1e8   :  { %v1382_v5 = vand.u32 4294901760, %v1381_v54  ;;  %v1182_v8 = vsel %vm161_vm0, %v1139_v10, 0  ;;  %3179 = vmatprep.subr.bf16.mxu1 %v4211_v50  ;;  %v3226_v1 = vpack.c.bf16 %v1381_v54, %v1374_v44 }
 0x1e9   :  { %v4218_v4 = vand.u32 4294901760, %v1182_v8  ;;  %3181 = vmatpush3.bf16.msra.mxu1 %v4211_v50  ;;  %v1377_v19 = vand.u32 4294901760, %v1376_v9 }
 0x1ea   :  { %v1383_v27 = vsub.f32 %v1381_v54, %v1382_v5  ;;  %v4224_v59 = vpack.c.bf16 %v1382_v5, %v1375_v58 }
 0x1eb   :  { %2924 = vmatprep.subr.mxu1 %v4218_v4  ;;  %v1388_v26 = vsub.f32 %v1182_v8, %v4218_v4 }
 0x1ec   :  { %v1384_v20 = vand.u32 4294901760, %v1383_v27 }
 0x1ed   :  { %2925 = vmatpush3.msra.mxu1 %v4218_v4  ;;  %v1389_v29 = vand.u32 4294901760, %v1388_v26 }
 0x1ee   :  { %3183 = vmatprep.subr.bf16.mxu1 %v4133_v39  ;;  %2927 = vmatmul.mubr.f32.vlgmr.msra.gmra.mrb[26].mxu1 %v1276_v11  ;;  %v3202_v23 = vpack.c.bf16 %v1384_v20, %v1377_v19 }
 0x1ef   :  { %3185 = vmatpush3.bf16.msra.mxu1 %v4133_v39  ;;  %2929 = vmatprep.mubr.f32.mxu1 %v1286_v33  ;;  %v1390_v39 = vsub.f32 %v1388_v26, %v1389_v29 }
 0x1f0   :  { %3187 = vmatprep.subr.bf16.mxu1 %v4145_v63 }
 0x1f1   :  { %v1391_v44 = vand.u32 4294901760, %v1390_v39 }
 0x1f2   :  { %2930 = vmatmul.mubr.f32.gmra.mrb[28].mxu1 %v1296_v22 }
 0x1f3   :  { %3189 = vmatpush3.bf16.msra.mxu1 %v4145_v63  ;;  %2958 = vmatprep.mubr.f32.mxu1 %v4113_v31 }
 0x1f4   :  { %3191 = vmatprep.subr.bf16.mxu1 %v4164_v46 }
 0x1f7   :  { %3193 = vmatpush3.bf16.msra.mxu1 %v4164_v46 }
 0x1f8   :  { %3195 = vmatprep.subr.bf16.mxu1 %v4190_v12 }
 0x1fb   :  { %3197 = vmatpush3.bf16.msra.mxu1 %v4190_v12 }
 0x1fc   :  { %3199 = vmatprep.subr.bf16.mxu1 %v3198_v61 }
 0x1ff   :  { %3201 = vmatpush3.bf16.msra.mxu1 %v3198_v61 }
 0x200   :  { %3203 = vmatprep.subr.bf16.mxu1 %v3202_v23 }
 0x203   :  { %3205 = vmatpush3.bf16.msra.mxu1 %v3202_v23 }
 0x204   :  { %2956 = vmatprep.subr.mxu1 %v1391_v44 }
 0x207   :  { %2957 = vmatpush3.msra.mxu1 %v1391_v44 }
 0x208   :  { %3207 = vmatprep.subr.bf16.mxu1 %v4126_v21  ;;  %2959 = vmatmul.mubr.f32.vlgmr.msra.gmra.mrb[26].mxu1 %v4175_v40 }
 0x209   :  { %3209 = vmatpush3.bf16.msra.mxu1 %v4126_v21  ;;  %2961 = vmatprep.mubr.f32.mxu1 %v4180_v0  ;;  %v1151_v21 = vpop.permute.xlu1 %1150 }
 0x20a   :  { %3211 = vmatprep.subr.bf16.mxu1 %v4136_v51 }
 0x20c   :  { %2962 = vmatmul.mubr.f32.gmra.mrb[28].mxu1 %v4186_v13 }
 0x20d   :  { %3213 = vmatpush3.bf16.msra.mxu1 %v4136_v51  ;;  %2990 = vmatprep.mubr.f32.mxu1 %v4116_v32  ;;  %v1919_v32 = vld [vmem:[%s4366_s5] sm:$0x1]  ;;  %s3538_s5 = smov [#allocation3]  }
 0x20e   :  { %3215 = vmatprep.subr.bf16.mxu1 %v4148_v15  ;;  %s2430_s18 = sshll.u32 %s3538_s5, 4  ;;  %s2431_s18 = int_to_ptr.vmem [resolvable:$true] %s2430_s18 }
 0x20f   :  { %s3510_s19 = scalar_lea.vmem %s2431_s18, 16  ;;  %s3514_s20 = scalar_lea.vmem %s2431_s18, 32 }
 0x210   :  { %p3511_p0 = scmp.ne.s32.totalorder %s2431_s18, %s3510_s19  ;;  %p3515_p1 = scmp.lt.s32.totalorder %s2431_s18, %s2431_s18 }
 0x211   :  { %3217 = vmatpush3.bf16.msra.mxu1 %v4148_v15  ;;  %p3516_p2 = scmp.lt.s32.totalorder %s3514_s20, %s3510_s19 }
 0x212   :  { %3219 = vmatprep.subr.bf16.mxu1 %v4171_v34 }
 0x213   :  { %p3517_p3 = por %p3516_p2, %p3515_p1 }
 0x215   :  { %3221 = vmatpush3.bf16.msra.mxu1 %v4171_v34  ;;  %p3518_p4 = pnand %p3517_p3, %p3511_p0 }
 0x216   :  { %3223 = vmatprep.subr.bf16.mxu1 %v4196_v14 }
 0x219   :  { %3225 = vmatpush3.bf16.msra.mxu1 %v4196_v14 }
 0x21a   :  { %3227 = vmatprep.subr.bf16.mxu1 %v3226_v1 }
 0x21d   :  { %3229 = vmatpush3.bf16.msra.mxu1 %v3226_v1 }
 0x21e   :  { %2988 = vmatprep.subr.mxu1 %v1388_v26 }
 0x221   :  { %2989 = vmatpush3.msra.mxu1 %v1388_v26 }
 0x222   :  { %3231 = vmatprep.subr.bf16.mxu1 %v4122_v62  ;;  %2991 = vmatmul.mubr.f32.vlgmr.msra.gmra.mrb[26].mxu1 %v4184_v18 }
 0x223   :  { %3233 = vmatpush3.bf16.msra.mxu1 %v4122_v62  ;;  %2993 = vmatprep.mubr.f32.mxu1 %v4193_v16 }
 0x224   :  { %3235 = vmatprep.subr.bf16.mxu1 %v4131_v28 }
 0x226   :  { %2994 = vmatmul.mubr.f32.gmra.mrb[28].mxu1 %v4202_v42 }
 0x227   :  { %3237 = vmatpush3.bf16.msra.mxu1 %v4131_v28  ;;  %3022 = vmatprep.mubr.f32.mxu1 %v1264_v35  ;;  %v1932_v35 = vsel %vm1930_vm4, %v1919_v32, 0 }
 0x228   :  { %3239 = vmatprep.subr.bf16.mxu1 %v4143_v60 }
 0x22b   :  { %3241 = vmatpush3.bf16.msra.mxu1 %v4143_v60 }
 0x22c   :  { %3243 = vmatprep.subr.bf16.mxu1 %v4162_v41 }
 0x22f   :  { %3245 = vmatpush3.bf16.msra.mxu1 %v4162_v41 }
 0x230   :  { %3247 = vmatprep.subr.bf16.mxu1 %v4188_v24 }
 0x233   :  { %3249 = vmatpush3.bf16.msra.mxu1 %v4188_v24 }
 0x234   :  { %3251 = vmatprep.subr.bf16.mxu1 %v4211_v50 }
 0x237   :  { %3253 = vmatpush3.bf16.msra.mxu1 %v4211_v50 }
 0x238   :  { %3020 = vmatprep.subr.mxu1 %v4218_v4 }
 0x23b   :  { %3021 = vmatpush3.msra.mxu1 %v4218_v4 }
 0x23c   :  { %3255 = vmatprep.subr.bf16.mxu1 %v4128_v52  ;;  %3023 = vmatmul.mubr.f32.vlgmr.msra.gmra.mrb[26].mxu1 %v1274_v36 }
 0x23d   :  { %3257 = vmatpush3.bf16.msra.mxu1 %v4128_v52  ;;  %3025 = vmatprep.mubr.f32.mxu1 %v1284_v56  ;;  %v1156_v52 = vpop.permute.xlu0 %1155 }
 0x23e   :  { %3259 = vmatprep.subr.bf16.mxu1 %v4140_v6 }
 0x240   :  { %3026 = vmatmul.mubr.f32.gmra.mrb[28].mxu1 %v1294_v43 }
 0x241   :  { %3261 = vmatpush3.bf16.msra.mxu1 %v4140_v6  ;;  %3054 = vmatprep.mubr.f32.mxu1 %v4113_v31  ;;  %v1161_v34 = vpop.permute.xlu0 %1160 }
 0x242   :  { %3263 = vmatprep.subr.bf16.mxu1 %v4155_v38 }
 0x245   :  { %3265 = vmatpush3.bf16.msra.mxu1 %v4155_v38  ;;  %v1166_v38 = vpop.permute.xlu1 %1165 }
 0x246   :  { %3267 = vmatprep.subr.bf16.mxu1 %v4178_v57 }
 0x249   :  { %3269 = vmatpush3.bf16.msra.mxu1 %v4178_v57  ;;  %v1924_v20 = vpop.permute.xlu1 %1923 }
 0x24a   :  { %3271 = vmatprep.subr.bf16.mxu1 %v4204_v45 }
 0x24d   :  { %3273 = vmatpush3.bf16.msra.mxu1 %v4204_v45 }
 0x24e   :  { %3275 = vmatprep.subr.bf16.mxu1 %v4224_v59 }
 0x251   :  { %3277 = vmatpush3.bf16.msra.mxu1 %v4224_v59  ;;  %v1926_v59 = vlaneseq }
 0x252   :  { %3052 = vmatprep.subr.mxu1 %v1389_v29 }
 0x253   :  { %v1927_v33 = vshrl.u32 %v1926_v59, 7 }
 0x255   :  { %3053 = vmatpush3.msra.mxu1 %v1389_v29  ;;  %v1928_v19 = vsub.s32 0, %v1927_v33 }
 0x256   :  { %3279 = vmatprep.subr.bf16.mxu1 %v4122_v62  ;;  %3055 = vmatmul.mubr.f32.vlgmr.msra.gmra.mrb[26].mxu1 %v4175_v40 }
 0x257   :  { %3281 = vmatpush3.bf16.msra.mxu1 %v4122_v62  ;;  %3057 = vmatprep.mubr.f32.mxu1 %v4180_v0  ;;  %v4317_v62 = vand.u32 4294901760, %v1932_v35  ;;  %v1929_v23 = vrot.slane %v1924_v20, %v1928_v19 }
 0x258   :  { %3283 = vmatprep.subr.bf16.mxu1 %v4131_v28 }
 0x25a   :  { %3058 = vmatmul.mubr.f32.gmra.mrb[28].mxu1 %v4186_v13 }
 0x25b   :  { %3285 = vmatpush3.bf16.msra.mxu1 %v4131_v28  ;;  %3086 = vmatprep.mubr.f32.mxu1 %v4113_v31  ;;  %v3537_v31 = vmov 0.0|0.0  }
 0x25c   :  { %3287 = vmatprep.subr.bf16.mxu1 %v4143_v60 }
 0x25f   :  { %3289 = vmatpush3.bf16.msra.mxu1 %v4143_v60  ;;  %v4320_v60 = vsub.f32 %v1932_v35, %v4317_v62 }
 0x260   :  { %3291 = vmatprep.subr.bf16.mxu1 %v4162_v41 }
 0x261   :  { %v2009_v18 = vand.u32 4294901760, %v4320_v60 }
 0x263   :  { %3293 = vmatpush3.bf16.msra.mxu1 %v4162_v41  ;;  %v2010_v45 = vsub.f32 %v4320_v60, %v2009_v18 }
 0x264   :  { %3295 = vmatprep.subr.bf16.mxu1 %v4188_v24 }
 0x267   :  { %3297 = vmatpush3.bf16.msra.mxu1 %v4188_v24 }
 0x268   :  { %3299 = vmatprep.subr.bf16.mxu1 %v4211_v50 }
 0x26b   :  { %3301 = vmatpush3.bf16.msra.mxu1 %v4211_v50  ;;  %v2011_v50 = vand.u32 4294901760, %v2010_v45 }
 0x26c   :  { %3084 = vmatprep.subr.mxu1 %v4218_v4 }
 0x26f   :  { %3085 = vmatpush3.msra.mxu1 %v4218_v4 }
 0x270   :  { %3087 = vmatmul.mubr.f32.vlgmr.msra.gmra.mrb[26].mxu1 %v4175_v40  ;;  %3302 = vmatprep.subr.bf16.mxu1 %v3537_v31 }
 0x271   :  { %3089 = vmatprep.mubr.f32.mxu1 %v4180_v0 }
 0x274   :  { %3090 = vmatmul.mubr.f32.gmra.mrb[28].mxu1 %v4186_v13 }
 0x275   :  { %3100 = vmatprep.mubr.msk.f32.mxu1 %vm3535_vm1, %v3534_v2 }
 0x343   :  { %v3088_v28 = vpop.f32.mrb[26].mxu1 }
 0x344   :  { %v3364_v51 = vadd.f32 %v3088_v28, %v1156_v52  ;;  %v1893_v6 = vpop.f32.mrb[27].mxu1 }
 0x345   :  { %v3365_v63 = vadd.f32 %v1893_v6, %v1151_v21 }
 0x346   :  { %v1916_v15 = vmax.f32 %v3364_v51, 0.0 }
 0x347   :  { %v1915_v41 = vmax.f32 %v3365_v63, 0.0  ;;  %v3091_v46 = vpop.f32.mrb[28].mxu1 }
 0x348   :  { %v1942_v40 = vand.u32 4294901760, %v1916_v15  ;;  %v3366_v57 = vadd.f32 %v3091_v46, %v1166_v38  ;;  %v1905_v0 = vpop.f32.mrb[29].mxu1 }
 0x349   :  { %v1939_v13 = vand.u32 4294901760, %v1915_v41  ;;  %v3367_v24 = vadd.f32 %v1905_v0, %v1161_v34 }
 0x34a   :  { %v2026_v12 = vsub.f32 %v1916_v15, %v1942_v40  ;;  %v1918_v16 = vmax.f32 %v3366_v57, 0.0 }
 0x34b   :  { %v3303_v14 = vpack.c.bf16 %v1942_v40, %v1939_v13  ;;  %v2019_v36 = vsub.f32 %v1915_v41, %v1939_v13  ;;  %v1917_v42 = vmax.f32 %v3367_v24, 0.0 }
 0x34c   :  { %v2027_v48 = vand.u32 4294901760, %v2026_v12  ;;  %v1936_v49 = vsel %vm1934_vm5, %v1918_v16, 0 }
 0x34d   :  { %v2020_v53 = vand.u32 4294901760, %v2019_v36  ;;  %v1948_v55 = vand.u32 4294901760, %v1936_v49  ;;  %v1945_v56 = vand.u32 4294901760, %v1917_v42  ;;  %3304 = vmatpush3.bf16.msra.mxu1 %v3303_v14  ;;  %v3315_v58 = vpack.c.bf16 %v2026_v12, %v2019_v36 }
 0x34e   :  { %v2028_v17 = vsub.f32 %v2026_v12, %v2027_v48  ;;  %3305 = vmatprep.subr.bf16.mxu1 %v3537_v31 }
 0x34f   :  { %v2021_v7 = vsub.f32 %v2019_v36, %v2020_v53  ;;  %v2040_v25 = vsub.f32 %v1936_v49, %v1948_v55  ;;  %v3306_v37 = vpack.c.bf16 %v1948_v55, %v1945_v56  ;;  %v2033_v47 = vsub.f32 %v1917_v42, %v1945_v56 }
 0x350   :  { %v2029_v43 = vand.u32 4294901760, %v2028_v17  ;;  %v3327_v54 = vpack.c.bf16 %v2027_v48, %v2020_v53 }
 0x351   :  { %v2022_v10 = vand.u32 4294901760, %v2021_v7  ;;  %v2041_v61 = vand.u32 4294901760, %v2040_v25  ;;  %v2034_v3 = vand.u32 4294901760, %v2033_v47  ;;  %3307 = vmatpush3.bf16.msra.mxu1 %v3306_v37  ;;  %v3318_v5 = vpack.c.bf16 %v2040_v25, %v2033_v47 }
 0x352   :  { %3308 = vmatprep.subr.bf16.mxu1 %v3537_v31 }
 0x353   :  { %v2042_v8 = vsub.f32 %v2040_v25, %v2041_v61  ;;  %v2035_v9 = vsub.f32 %v2033_v47, %v2034_v3  ;;  %v3309_v1 = vpack.c.bf16 %v2029_v43, %v2022_v10  ;;  %v3330_v4 = vpack.c.bf16 %v2041_v61, %v2034_v3 }
 0x354   :  { %3101 = vmatmul.mubr.f32.vlgmr.msra.gmra.mrb[30].mxu1 %v2011_v50 }
 0x355   :  { %v2043_v11 = vand.u32 4294901760, %v2042_v8  ;;  %v2036_v27 = vand.u32 4294901760, %v2035_v9  ;;  %3310 = vmatpush3.bf16.msra.mxu1 %v3309_v1  ;;  %3111 = vmatprep.mubr.msk.f32.mxu1 %vm3535_vm1, %v3534_v2 }
 0x356   :  { %3311 = vmatprep.subr.bf16.mxu1 %v3537_v31 }
 0x357   :  { %v3312_v30 = vpack.c.bf16 %v2043_v11, %v2036_v27 }
 0x359   :  { %3313 = vmatpush3.bf16.msra.mxu1 %v3312_v30 }
 0x35a   :  { %3314 = vmatprep.subr.bf16.mxu1 %v3537_v31 }
 0x35c   :  { %3112 = vmatmul.mubr.f32.vlgmr.msra.gmra.mrb[30].mxu1 %v4317_v62 }
 0x35d   :  { %3316 = vmatpush3.bf16.msra.mxu1 %v3315_v58  ;;  %3122 = vmatprep.mubr.msk.f32.mxu1 %vm3535_vm1, %v3534_v2 }
 0x35e   :  { %3317 = vmatprep.subr.bf16.mxu1 %v3537_v31 }
 0x361   :  { %3319 = vmatpush3.bf16.msra.mxu1 %v3318_v5 }
 0x362   :  { %3320 = vmatprep.subr.bf16.mxu1 %v3537_v31 }
 0x364   :  { %3123 = vmatmul.mubr.f32.vlgmr.msra.gmra.mrb[30].mxu1 %v4320_v60 }
 0x365   :  { %3322 = vmatpush3.bf16.msra.mxu1 %v3303_v14  ;;  %3133 = vmatprep.mubr.msk.f32.mxu1 %vm3535_vm1, %v3534_v2 }
 0x366   :  { %3323 = vmatprep.subr.bf16.mxu1 %v3537_v31 }
 0x369   :  { %3325 = vmatpush3.bf16.msra.mxu1 %v3306_v37 }
 0x36a   :  { %3326 = vmatprep.subr.bf16.mxu1 %v3537_v31 }
 0x36c   :  { %3134 = vmatmul.mubr.f32.vlgmr.msra.gmra.mrb[30].mxu1 %v2009_v18 }
 0x36d   :  { %3328 = vmatpush3.bf16.msra.mxu1 %v3327_v54  ;;  %3144 = vmatprep.mubr.msk.f32.mxu1 %vm3535_vm1, %v3534_v2 }
 0x36e   :  { %3329 = vmatprep.subr.bf16.mxu1 %v3537_v31 }
 0x371   :  { %3331 = vmatpush3.bf16.msra.mxu1 %v3330_v4 }
 0x372   :  { %3332 = vmatprep.subr.bf16.mxu1 %v3537_v31 }
 0x374   :  { %3145 = vmatmul.mubr.f32.vlgmr.msra.gmra.mrb[30].mxu1 %v4317_v62 }
 0x375   :  { %3334 = vmatpush3.bf16.msra.mxu1 %v3303_v14  ;;  %3155 = vmatprep.mubr.msk.f32.mxu1 %vm3535_vm1, %v3534_v2 }
 0x376   :  { %3335 = vmatprep.subr.bf16.mxu1 %v3537_v31 }
 0x379   :  { %3337 = vmatpush3.bf16.msra.mxu1 %v3306_v37 }
 0x37c   :  { %3156 = vmatmul.mubr.f32.vlgmr.msra.gmra.mrb[30].mxu1 %v4317_v62 }
 0x44f   :  { %v2419_v22 = vpop.f32.mrb[30].mxu1 }
 0x450   :  { %v3368_v26 = vadd.f32 %v2419_v22, %v1929_v23  ;;  %v3157_v29 = vpop.f32.mrb[31].mxu1 }
 0x452   :  { %2423 = vst [vmem:[#allocation3] sm:$0x1] %v3368_v26 }
 0x453   :  { %3521 = shalt.err (!%p3518_p4)
}
 0x454   :  { %s3522_s23 = scalar_lea.hbm %s4368_s7, 16 }
 0x455   :  { %p3523_p5 = scmp.ne.s32.totalorder %s4368_s7, %s3522_s23  ;;  %p3526_p6 = scmp.lt.u32.totalorder %s3522_s23, %s4368_s7 }
 0x457   :  { %p3528_p7 = pnand %p3526_p6, %p3523_p5 }
 0x459   :  { %3531 = shalt.err (!%p3528_p7)
}
 0x45a   :  { %2433 = dma.vmem_to_hbm [thread:$0]  %s2431_s18, 16, %s4368_s7, [#allocation4]  }
 0x45b   :  { %3532 = dma.done.wait [#allocation4], 16  }
 0x45c   :  { %3533 = vsyncadd [#allocation4], 4294967280 }
 0x45d   :  { %2437 = vsyncpa [#allocation4], 1 }

</bundles_post_ra>
